<compile_context>
chip_gen: v5e
topology: v5e:2x2
jax: 0.10.0
libtpu: 0.0.40
codegen_flags: <defaults>
</compile_context>

<pallas_src>
import functools

import jax
import jax.numpy as jnp
from jax.experimental import pallas as pl
from jax.experimental.pallas import tpu as pltpu

BN_EPS = 1e-5
MATMUL_DTYPE = jnp.bfloat16   # MXU operand dtype; accumulation stays f32.
# TODO(synk): int8 (v6e) / fp8 (v7x) operand narrowing would raise MXU throughput on the
# under-filled K=128/M=64 shapes, but needs the 3e-2 accuracy budget re-validated first.


# --------------------------------------------------------------------------------------
# Kernel: one batch tile (TB, D) f32 in, (TB, 1) probabilities out, all in VMEM.
# --------------------------------------------------------------------------------------
def _mlp_kernel(x_ref, w1_ref, b1_ref, w2_ref, b2_ref, w3_ref, b3_ref,
                w4_ref, b4_ref, out_ref):
    # Cast the streamed f32 tile to bf16 on the VPU (hides under MXU slack).
    x = x_ref[...].astype(MATMUL_DTYPE)                         # (TB, 128) bf16

    def layer(h, w_ref, b_ref):
        # (TB, in) @ (in, out) on the MXU with f32 accumulation; bias + ReLU on the VPU.
        acc = jnp.dot(h, w_ref[...], preferred_element_type=jnp.float32)
        return jnp.maximum(acc + b_ref[...], 0.0)                # f32 (TB, out)

    h1 = layer(x, w1_ref, b1_ref)                                # (TB, 256)
    h2 = layer(h1.astype(MATMUL_DTYPE), w2_ref, b2_ref)          # (TB, 128)
    h3 = layer(h2.astype(MATMUL_DTYPE), w3_ref, b3_ref)          # (TB, 64)  f32

    # Head Linear(prev, 1): VPU multiply by the (1, 64) weight row + XLU lane reduce.
    logits = jnp.sum(h3 * w4_ref[...], axis=-1, keepdims=True) + b4_ref[...]
    out_ref[...] = jax.nn.sigmoid(logits)                        # (TB, 1) f32


# --------------------------------------------------------------------------------------
# Parameters (deterministic synthetic init, PyTorch layout: weight = (out, in))
# --------------------------------------------------------------------------------------
def make_raw_params(input_dim=128, hidden_layers=(256, 128, 64), seed=0):
    key = jax.random.PRNGKey(seed)
    dims = [input_dim, *hidden_layers]
    layers = []
    for i in range(len(hidden_layers)):
        din, dout = dims[i], dims[i + 1]
        key, kw, kb, kg, kbe, km, kv = jax.random.split(key, 7)
        layers.append(dict(
            w=jax.random.normal(kw, (dout, din), jnp.float32) / jnp.sqrt(din),
            b=0.01 * jax.random.normal(kb, (dout,), jnp.float32),
            gamma=1.0 + 0.1 * jax.random.normal(kg, (dout,), jnp.float32),
            beta=0.1 * jax.random.normal(kbe, (dout,), jnp.float32),
            mean=0.1 * jax.random.normal(km, (dout,), jnp.float32),
            var=1.0 + 0.1 * jax.random.uniform(kv, (dout,), jnp.float32),
        ))
    key, kw, kb = jax.random.split(key, 3)
    head = dict(
        w=jax.random.normal(kw, (1, dims[-1]), jnp.float32) / jnp.sqrt(dims[-1]),
        b=0.01 * jax.random.normal(kb, (1,), jnp.float32),
    )
    return layers, head


def fold_params(layers, head):
    """Fold eval-mode BN + bias into each layer; pre-transpose weights to (in, out)."""
    kparams = []
    for p in layers:
        scale = p["gamma"] * jax.lax.rsqrt(p["var"] + BN_EPS)            # (out,)
        w_t = (p["w"] * scale[:, None]).T.astype(MATMUL_DTYPE)           # (in, out) bf16
        b_f = ((p["b"] - p["mean"]) * scale + p["beta"]).astype(jnp.float32)
        kparams += [w_t, b_f[None, :]]                                   # bias as (1, out)
    kparams += [head["w"].astype(jnp.float32),                           # (1, prev) row
                head["b"].reshape(1, 1).astype(jnp.float32)]             # (1, 1)
    return kparams


# --------------------------------------------------------------------------------------
# Tile / VMEM policy
# --------------------------------------------------------------------------------------
def _round_up(n, m):
    return ((n + m - 1) // m) * m


def _default_tile_cap():
    """Generation-aware batch-tile cap (lanes of batch per grid step)."""
    try:
        vmem_bytes = int(pltpu.get_tpu_info().vmem_capacity_bytes)
    except Exception:
        vmem_bytes = 64 << 20            # conservative fallback (v7x-sized)
    # 128 MiB VMEM (v5e/v6e): big single-core tiles pay off.  64 MiB (v7x, 2 TCs):
    # smaller tiles keep >= 2 grid steps sooner and halve the per-TC footprint.
    return 4096 if vmem_bytes >= (100 << 20) else 2048


def _choose_tile(batch, cap):
    if batch <= cap:
        return _round_up(max(batch, 8), 8)        # single grid step, minimal padding
    # Keep at least 2 grid steps so dimension_semantics=("parallel",) can split the
    # batch across TensorCores (v7x megacore); tile stays a multiple of 128 lanesworth.
    return max(128, min(cap, _round_up((batch + 1) // 2, 128)))


def _vmem_limit_bytes(tile_b, d_in):
    x_tile = tile_b * d_in * 4 * 2                 # f32 input tile, double buffered
    out_tile = tile_b * 128 * 4 * 2                # (TB,1) block lane-pads to 128
    act_f32 = tile_b * (256 + 128 + 64) * 4        # h1/h2/h3 temporaries
    act_bf16 = tile_b * (d_in + 256 + 128) * 2     # bf16 re-casts fed to the MXU
    weights = 512 * 1024                           # folded weights + biases (generous)
    est = x_tile + out_tile + act_f32 + act_bf16 + weights
    # >= 32 MiB (safe explicit scoped limit on all generations), <= 48 MiB (stays well
    # under v7x's 64 MiB physical per TC even for user-forced large tiles).
    return int(min(48 << 20, max(32 << 20, est * 1.5)))


# --------------------------------------------------------------------------------------
# Wrapper
# --------------------------------------------------------------------------------------
@functools.partial(jax.jit, static_argnames=("tile_b",))
def _forward(x, kparams, tile_b):
    B, D = x.shape
    bp = _round_up(B, tile_b)
    if bp != B:                                    # pad only when misaligned
        x = jnp.pad(x, ((0, bp - B), (0, 0)))
    grid = (bp // tile_b,)

    # Weights/biases: constant block index -> fetched once, VMEM-resident across steps.
    weight_specs = [pl.BlockSpec(p.shape, lambda g: (0, 0)) for p in kparams]

    out = pl.pallas_call(
        _mlp_kernel,
        out_shape=jax.ShapeDtypeStruct((bp, 1), jnp.float32),
        grid_spec=pltpu.PrefetchScalarGridSpec(
            num_scalar_prefetch=0,
            grid=grid,
            in_specs=[pl.BlockSpec((tile_b, D), lambda g: (g, 0))] + weight_specs,
            out_specs=pl.BlockSpec((tile_b, 1), lambda g: (g, 0)),
        ),
        compiler_params=pltpu.CompilerParams(
            dimension_semantics=("parallel",),               # batch tiles independent
            vmem_limit_bytes=_vmem_limit_bytes(tile_b, D),
        ),
    )(x, *kparams)

    return out[:B, 0]   # matches .squeeze(-1) of the PyTorch forward


def research_quality_predictor(x, kparams, *, tile_b=None):
    """Runs the fused Pallas kernel; returns probabilities of shape (B,)."""
    B = x.shape[0]
    if tile_b is None:
        tile_b = _choose_tile(B, _default_tile_cap())
    assert tile_b % 8 == 0, "batch tile must be a multiple of the 8-sublane width"
    return _forward(x, kparams, tile_b)


# --------------------------------------------------------------------------------------
# Pure-JAX references
# --------------------------------------------------------------------------------------
def reference_eval_mode(x, layers, head):
    """Exact PyTorch eval-mode forward in f32 (unfolded BN, dropout = identity)."""
    h = x.astype(jnp.float32)
    for p in layers:
        h = h @ p["w"].T + p["b"]
        h = (h - p["mean"]) * (p["gamma"] / jnp.sqrt(p["var"] + BN_EPS)) + p["beta"]
        h = jnp.maximum(h, 0.0)
    logits = h @ head["w"].T + head["b"]
    return jax.nn.sigmoid(logits).squeeze(-1)


def reference_folded(x, kparams):
    """Mirrors the kernel math (folded BN, bf16 MXU operands, f32 accumulation)."""
    h = x.astype(MATMUL_DTYPE)
    for i in range(3):
        w_t, b = kparams[2 * i], kparams[2 * i + 1]
        h = jnp.maximum(jnp.dot(h, w_t, preferred_element_type=jnp.float32) + b, 0.0)
        if i < 2:
            h = h.astype(MATMUL_DTYPE)
    w4, b4 = kparams[6], kparams[7]
    logits = jnp.sum(h * w4, axis=-1) + b4[0, 0]
    return jax.nn.sigmoid(logits)


# --------------------------------------------------------------------------------------
if __name__ == "__main__":
    input_dim = 128
    layers, head = make_raw_params(input_dim=input_dim)
    kparams = fold_params(layers, head)

    # (batch, forced tile): default single-step small-batch path, and a forced
    # multi-tile grid with a padded tail to exercise the pipelined path.
    for batch, tb in ((8, None), (300, 128)):
        x = jax.random.normal(jax.random.PRNGKey(0), (batch, input_dim), jnp.float32)
        out = jax.block_until_ready(research_quality_predictor(x, kparams, tile_b=tb))
        assert out.shape == (batch,)

        # Tight check against a reference that mirrors the kernel's folded/bf16 math.
        ref_fold = reference_folded(x, kparams)
        assert jnp.allclose(out, ref_fold, atol=1e-4, rtol=1e-4), "mismatch vs folded ref"

        # Loose semantic check against the exact f32 eval-mode PyTorch math
        # (difference comes only from bf16 MXU operands).
        ref_exact = reference_eval_mode(x, layers, head)
        assert jnp.allclose(out, ref_exact, atol=3e-2, rtol=3e-2), "mismatch vs exact ref"

    print("KERNEL_OK")
</pallas_src>

<mosaic_0001>
module attributes {stable_mosaic.version = 11 : i64} {
  func.func @_mlp_kernel(%arg0: i32, %arg1: memref<8x128xf32, #tpu.memory_space<vmem>>, %arg2: memref<128x256xbf16, #tpu.memory_space<vmem>>, %arg3: memref<1x256xf32, #tpu.memory_space<vmem>>, %arg4: memref<256x128xbf16, #tpu.memory_space<vmem>>, %arg5: memref<1x128xf32, #tpu.memory_space<vmem>>, %arg6: memref<128x64xbf16, #tpu.memory_space<vmem>>, %arg7: memref<1x64xf32, #tpu.memory_space<vmem>>, %arg8: memref<1x64xf32, #tpu.memory_space<vmem>>, %arg9: memref<1x1xf32, #tpu.memory_space<vmem>>, %arg10: memref<8x1xf32, #tpu.memory_space<vmem>>) attributes {dimension_semantics = [#tpu.dimension_semantics<parallel>], iteration_bounds = array<i64: 1>, scalar_prefetch = 0 : i64, scratch_operands = 0 : i64, tpu.core_type = #tpu.core_type<tc>, window_params = [{transform_indices = @transform_0, window_bounds = array<i64: 8, 128>}, {pipeline_mode = #tpu.pipeline_mode<synchronous>, transform_indices = @transform_1, window_bounds = array<i64: 128, 256>}, {pipeline_mode = #tpu.pipeline_mode<synchronous>, transform_indices = @transform_2, window_bounds = array<i64: 1, 256>}, {pipeline_mode = #tpu.pipeline_mode<synchronous>, transform_indices = @transform_3, window_bounds = array<i64: 256, 128>}, {pipeline_mode = #tpu.pipeline_mode<synchronous>, transform_indices = @transform_4, window_bounds = array<i64: 1, 128>}, {pipeline_mode = #tpu.pipeline_mode<synchronous>, transform_indices = @transform_5, window_bounds = array<i64: 128, 64>}, {pipeline_mode = #tpu.pipeline_mode<synchronous>, transform_indices = @transform_6, window_bounds = array<i64: 1, 64>}, {pipeline_mode = #tpu.pipeline_mode<synchronous>, transform_indices = @transform_7, window_bounds = array<i64: 1, 64>}, {pipeline_mode = #tpu.pipeline_mode<synchronous>, transform_indices = @transform_8, window_bounds = array<i64: 1, 1>}, {transform_indices = @transform_9, window_bounds = array<i64: 8, 1>}]} {
    %c0 = arith.constant 0 : index
    %c0_0 = arith.constant 0 : index
    %0 = vector.load %arg1[%c0, %c0_0] : memref<8x128xf32, #tpu.memory_space<vmem>>, vector<8x128xf32>
    %1 = arith.truncf %0 : vector<8x128xf32> to vector<8x128xbf16>
    %c0_1 = arith.constant 0 : index
    %c0_2 = arith.constant 0 : index
    %2 = vector.load %arg2[%c0_1, %c0_2] : memref<128x256xbf16, #tpu.memory_space<vmem>>, vector<128x256xbf16>
    %cst = arith.constant dense<0.000000e+00> : vector<8x256xf32>
    %3 = tpu.matmul %1, %2, %cst {dimension_numbers = #tpu.dot_dimension_numbers<[1], [0], [0], [1], [0, 0, 1, 1], [], []>} : vector<8x128xbf16>, vector<128x256xbf16>, vector<8x256xf32> -> vector<8x256xf32>
    %c0_3 = arith.constant 0 : index
    %c0_4 = arith.constant 0 : index
    %4 = vector.load %arg3[%c0_3, %c0_4] : memref<1x256xf32, #tpu.memory_space<vmem>>, vector<1x256xf32>
    %5 = vector.broadcast %4 : vector<1x256xf32> to vector<8x256xf32>
    %6 = arith.addf %3, %5 : vector<8x256xf32>
    %cst_5 = arith.constant 0.000000e+00 : f32
    %7 = vector.broadcast %cst_5 : f32 to vector<8x256xf32>
    %8 = arith.maximumf %6, %7 : vector<8x256xf32>
    %9 = arith.truncf %8 : vector<8x256xf32> to vector<8x256xbf16>
    %c0_6 = arith.constant 0 : index
    %c0_7 = arith.constant 0 : index
    %10 = vector.load %arg4[%c0_6, %c0_7] : memref<256x128xbf16, #tpu.memory_space<vmem>>, vector<256x128xbf16>
    %cst_8 = arith.constant dense<0.000000e+00> : vector<8x128xf32>
    %11 = tpu.matmul %9, %10, %cst_8 {dimension_numbers = #tpu.dot_dimension_numbers<[1], [0], [0], [1], [0, 0, 1, 1], [], []>} : vector<8x256xbf16>, vector<256x128xbf16>, vector<8x128xf32> -> vector<8x128xf32>
    %c0_9 = arith.constant 0 : index
    %c0_10 = arith.constant 0 : index
    %12 = vector.load %arg5[%c0_9, %c0_10] : memref<1x128xf32, #tpu.memory_space<vmem>>, vector<1x128xf32>
    %13 = vector.broadcast %12 : vector<1x128xf32> to vector<8x128xf32>
    %14 = arith.addf %11, %13 : vector<8x128xf32>
    %cst_11 = arith.constant 0.000000e+00 : f32
    %15 = vector.broadcast %cst_11 : f32 to vector<8x128xf32>
    %16 = arith.maximumf %14, %15 : vector<8x128xf32>
    %17 = arith.truncf %16 : vector<8x128xf32> to vector<8x128xbf16>
    %c0_12 = arith.constant 0 : index
    %c0_13 = arith.constant 0 : index
    %18 = vector.load %arg6[%c0_12, %c0_13] : memref<128x64xbf16, #tpu.memory_space<vmem>>, vector<128x64xbf16>
    %cst_14 = arith.constant dense<0.000000e+00> : vector<8x64xf32>
    %19 = tpu.matmul %17, %18, %cst_14 {dimension_numbers = #tpu.dot_dimension_numbers<[1], [0], [0], [1], [0, 0, 1, 1], [], []>} : vector<8x128xbf16>, vector<128x64xbf16>, vector<8x64xf32> -> vector<8x64xf32>
    %c0_15 = arith.constant 0 : index
    %c0_16 = arith.constant 0 : index
    %20 = vector.load %arg7[%c0_15, %c0_16] : memref<1x64xf32, #tpu.memory_space<vmem>>, vector<1x64xf32>
    %21 = vector.broadcast %20 : vector<1x64xf32> to vector<8x64xf32>
    %22 = arith.addf %19, %21 : vector<8x64xf32>
    %cst_17 = arith.constant 0.000000e+00 : f32
    %23 = vector.broadcast %cst_17 : f32 to vector<8x64xf32>
    %24 = arith.maximumf %22, %23 : vector<8x64xf32>
    %c0_18 = arith.constant 0 : index
    %c0_19 = arith.constant 0 : index
    %25 = vector.load %arg8[%c0_18, %c0_19] : memref<1x64xf32, #tpu.memory_space<vmem>>, vector<1x64xf32>
    %26 = vector.broadcast %25 : vector<1x64xf32> to vector<8x64xf32>
    %27 = arith.mulf %24, %26 : vector<8x64xf32>
    %cst_20 = arith.constant dense<0.000000e+00> : vector<8xf32>
    %28 = vector.multi_reduction <add>, %27, %cst_20 [1] : vector<8x64xf32> to vector<8xf32>
    %29 = vector.shape_cast %28 : vector<8xf32> to vector<8x1xf32>
    %c0_21 = arith.constant 0 : index
    %c0_22 = arith.constant 0 : index
    %30 = vector.load %arg9[%c0_21, %c0_22] : memref<1x1xf32, #tpu.memory_space<vmem>>, vector<1x1xf32>
    %31 = vector.broadcast %30 : vector<1x1xf32> to vector<8x1xf32>
    %32 = arith.addf %29, %31 : vector<8x1xf32>
    %33 = arith.negf %32 : vector<8x1xf32>
    %34 = math.exp %33 : vector<8x1xf32>
    %cst_23 = arith.constant 1.000000e+00 : f32
    %35 = vector.broadcast %cst_23 : f32 to vector<8x1xf32>
    %36 = arith.addf %35, %34 : vector<8x1xf32>
    %37 = arith.divf %35, %36 : vector<8x1xf32>
    %c0_24 = arith.constant 0 : index
    %c0_25 = arith.constant 0 : index
    %38 = vector.load %arg10[%c0_24, %c0_25] : memref<8x1xf32, #tpu.memory_space<vmem>>, vector<8x1xf32>
    tpu.vector_store %arg10[%c0_24, %c0_25], %37 {strides = array<i32>} : memref<8x1xf32, #tpu.memory_space<vmem>>, vector<8x1xf32>,
    return
  }
  func.func @transform_0(%arg0: i32) -> (i32, i32) {
    %c0_i32 = arith.constant 0 : i32
    %c0_i32_0 = arith.constant 0 : i32
    return %arg0, %c0_i32 : i32, i32
  }
  func.func @transform_1(%arg0: i32) -> (i32, i32) {
    %c0_i32 = arith.constant 0 : i32
    %c0_i32_0 = arith.constant 0 : i32
    %c0_i32_1 = arith.constant 0 : i32
    return %c0_i32, %c0_i32_0 : i32, i32
  }
  func.func @transform_2(%arg0: i32) -> (i32, i32) {
    %c0_i32 = arith.constant 0 : i32
    %c0_i32_0 = arith.constant 0 : i32
    %c0_i32_1 = arith.constant 0 : i32
    return %c0_i32, %c0_i32_0 : i32, i32
  }
  func.func @transform_3(%arg0: i32) -> (i32, i32) {
    %c0_i32 = arith.constant 0 : i32
    %c0_i32_0 = arith.constant 0 : i32
    %c0_i32_1 = arith.constant 0 : i32
    return %c0_i32, %c0_i32_0 : i32, i32
  }
  func.func @transform_4(%arg0: i32) -> (i32, i32) {
    %c0_i32 = arith.constant 0 : i32
    %c0_i32_0 = arith.constant 0 : i32
    %c0_i32_1 = arith.constant 0 : i32
    return %c0_i32, %c0_i32_0 : i32, i32
  }
  func.func @transform_5(%arg0: i32) -> (i32, i32) {
    %c0_i32 = arith.constant 0 : i32
    %c0_i32_0 = arith.constant 0 : i32
    %c0_i32_1 = arith.constant 0 : i32
    return %c0_i32, %c0_i32_0 : i32, i32
  }
  func.func @transform_6(%arg0: i32) -> (i32, i32) {
    %c0_i32 = arith.constant 0 : i32
    %c0_i32_0 = arith.constant 0 : i32
    %c0_i32_1 = arith.constant 0 : i32
    return %c0_i32, %c0_i32_0 : i32, i32
  }
  func.func @transform_7(%arg0: i32) -> (i32, i32) {
    %c0_i32 = arith.constant 0 : i32
    %c0_i32_0 = arith.constant 0 : i32
    %c0_i32_1 = arith.constant 0 : i32
    return %c0_i32, %c0_i32_0 : i32, i32
  }
  func.func @transform_8(%arg0: i32) -> (i32, i32) {
    %c0_i32 = arith.constant 0 : i32
    %c0_i32_0 = arith.constant 0 : i32
    %c0_i32_1 = arith.constant 0 : i32
    return %c0_i32, %c0_i32_0 : i32, i32
  }
  func.func @transform_9(%arg0: i32) -> (i32, i32) {
    %c0_i32 = arith.constant 0 : i32
    %c0_i32_0 = arith.constant 0 : i32
    return %arg0, %c0_i32 : i32, i32
  }
}

</mosaic_0001>

<bundles_post_ra>
// kernel: _forward.1
= control target key start
LH: loop header
LB: loop body
LE: loop exit
PB: predicated region body
PF: predicated region fallthrough
CT: control target
= control target key end

     0   :  { %s857_s0 = inlined_call_operand.vmem [shape: f32[8,128], index: 0, kind: input, shape index: {}]   ;;  %s858_s1 = inlined_call_operand.hbm [shape: bf16[128,256], index: 1, kind: input, shape index: {}]   ;;  %s859_s2 = inlined_call_operand.vmem [shape: f32[1,256], index: 2, kind: input, shape index: {}]   ;;  %s860_s3 = inlined_call_operand.hbm [shape: bf16[256,128], index: 3, kind: input, shape index: {}]   ;;  %s861_s4 = inlined_call_operand.vmem [shape: f32[1,128], index: 4, kind: input, shape index: {}]   ;;  %s862_s5 = inlined_call_operand.vmem [shape: bf16[128,64], index: 5, kind: input, shape index: {}]   ;;  %s863_s6 = inlined_call_operand.vmem [shape: f32[1,64], index: 6, kind: input, shape index: {}]   ;;  %s864_s7 = inlined_call_operand.vmem [shape: f32[1,64], index: 7, kind: input, shape index: {}]   ;;  %s865_s8 = inlined_call_operand.<no memory space> [shape: f32[1,1], index: 8, kind: input, shape index: {}]   ;;  %s866_s9 = inlined_call_operand.vmem [shape: f32[8,1], index: 9, kind: output, shape index: {}]  }
   0x1   :  { %v14_v0 = vstv %s865_s8 }
   0x2   :  { %15 = vst [vmem:[#allocation2] sm:$0x1] %v14_v0 }
   0x3   :  { %16 = vsyncpa [#allocation4], 0  ;;  %s24_s13 = sshll.u32 %s858_s1, 4  ;;  %s25_s13 = int_to_ptr.hbm [resolvable:$true] %s24_s13 }
   0x4   :  { %17 = vsyncpa [#allocation6], 0  ;;  %s750_s14 = smov [#allocation3]   ;;  %s39_s18 = sshll.u32 %s860_s3, 4  ;;  %s40_s18 = int_to_ptr.hbm [resolvable:$true] %s39_s18 }
   0x5   :  { %s26_s15 = sshll.u32 %s750_s14, 4  ;;  %s751_s19 = smov 128   ;;  %s27_s15 = int_to_ptr.vmem [resolvable:$true] %s26_s15 }
   0x6   :  { %s752_s20 = smov 8   ;;  %s753_s8 = smov [#allocation5]  }
   0x7   :  { %32 = dma.hbm_to_vmem [thread:$0]  %s25_s13, 2048, %s27_s15, [#allocation4], %s751_s19, %s751_s19, %s752_s20  }
   0x8   :  { %s41_s21 = sshll.u32 %s753_s8, 4  ;;  %s754_s22 = smov 64   ;;  %s42_s21 = int_to_ptr.vmem [resolvable:$true] %s41_s21 }
   0x9   :  { %s755_s23 = smov 4  }
   0xa   :  { %47 = dma.hbm_to_vmem [thread:$0]  %s40_s18, 2048, %s42_s21, [#allocation6], %s754_s22, %s754_s22, %s755_s23  }
   0xb   :  { %746 = dma.done.wait [#allocation4], 2048  }
   0xc   :  { %747 = vsyncadd [#allocation4], 4294965248 }
   0xd   :  { %748 = dma.done.wait [#allocation6], 2048  }
   0xe   :  { %749 = vsyncadd [#allocation6], 4294965248  ;;  %v541_v1 = vld [vmem:[#allocation3 + $0x70] sm:$0xf]  ;;  %v659_v2 = vld [vmem:[#allocation3 + $0x74] sm:$0xf0] }
   0xf   :  { %v658_v3 = vld [vmem:[#allocation3 + $0x74] sm:$0xf]  ;;  %v542_v4 = vor.u32 %v659_v2, %v541_v1  ;;  %v543_v5 = vld [vmem:[#allocation3 + $0x78] sm:$0xf0]  ;;  %v533_v6 = vld [vmem:[#allocation3 + $0x60] sm:$0xf] }
  0x10   :  { %v657_v7 = vld [vmem:[#allocation3 + $0x64] sm:$0xf0]  ;;  %v546_v8 = vor.u32 %v658_v3, %v543_v5  ;;  %v656_v9 = vld [vmem:[#allocation3 + $0x64] sm:$0xf]  ;;  %v535_v10 = vld [vmem:[#allocation3 + $0x68] sm:$0xf0] }
  0x11   :  { %170 = vmatpush.bf16.msra.mxu0 %v542_v4  ;;  %v534_v11 = vor.u32 %v657_v7, %v533_v6  ;;  %v538_v12 = vor.u32 %v656_v9, %v535_v10  ;;  %v525_v13 = vld [vmem:[#allocation3 + $0x50] sm:$0xf]  ;;  %v655_v14 = vld [vmem:[#allocation3 + $0x54] sm:$0xf0]  ;;  %v654_v15 = vld [vmem:[#allocation3 + $0x54] sm:$0xf] }
  0x12   :  { %183 = vmatpush.bf16.msra.mxu1 %v546_v8  ;;  %v527_v16 = vld [vmem:[#allocation3 + $0x58] sm:$0xf0]  ;;  %v526_v17 = vor.u32 %v655_v14, %v525_v13  ;;  %v517_v19 = vld [vmem:[#allocation3 + $0x40] sm:$0xf]  ;;  %v653_v20 = vld [vmem:[#allocation3 + $0x44] sm:$0xf0] }
  0x13   :  { %v530_v18 = vor.u32 %v654_v15, %v527_v16  ;;  %v652_v21 = vld [vmem:[#allocation3 + $0x44] sm:$0xf]  ;;  %v519_v22 = vld [vmem:[#allocation3 + $0x48] sm:$0xf0]  ;;  %v518_v23 = vor.u32 %v653_v20, %v517_v19  ;;  %v667_v24 = vld [vmem:[#allocation5 + $0x38] sm:$0xff]  ;;  %vm447_vm0 = vcmask 523264  }
  0x14   :  { %v675_v25 = vld [vmem:[#allocation5 + $0x78] sm:$0xff]  ;;  %v522_v26 = vor.u32 %v652_v21, %v519_v22  ;;  %v509_v27 = vld [vmem:[#allocation3 + $0x30] sm:$0xf]  ;;  %v650_v29 = vld [vmem:[#allocation3 + $0x34] sm:$0xf]  ;;  %332 = vmatpush.bf16.msra.mxu2 %v667_v24  ;;  %vm475_vm4 = vcmask 7168  }
  0x15   :  { %171 = vmatpush.bf16.msra.mxu0 %v534_v11  ;;  %v651_v28 = vld [vmem:[#allocation3 + $0x34] sm:$0xf0]  ;;  %v511_v30 = vld [vmem:[#allocation3 + $0x38] sm:$0xf0]  ;;  %345 = vmatpush.bf16.msra.mxu3 %v675_v25  ;;  %v666_v31 = vld [vmem:[#allocation5 + $0x30] sm:$0xff] }
  0x16   :  { %184 = vmatpush.bf16.msra.mxu1 %v538_v12  ;;  %v674_v32 = vld [vmem:[#allocation5 + $0x70] sm:$0xff]  ;;  %v501_v33 = vld [vmem:[#allocation3 + $0x20] sm:$0xf]  ;;  %v510_v34 = vor.u32 %v651_v28, %v509_v27  ;;  %v649_v35 = vld [vmem:[#allocation3 + $0x24] sm:$0xf0]  ;;  %v514_v36 = vor.u32 %v650_v29, %v511_v30 }
  0x17   :  { %v648_v37 = vld [vmem:[#allocation3 + $0x24] sm:$0xf]  ;;  %v503_v38 = vld [vmem:[#allocation3 + $0x28] sm:$0xf0]  ;;  %v502_v41 = vor.u32 %v649_v35, %v501_v33  ;;  %v493_v43 = vld [vmem:[#allocation3 + $0x10] sm:$0xf] }
  0x18   :  { %333 = vmatpush.bf16.msra.mxu2 %v666_v31  ;;  %v665_v39 = vld [vmem:[#allocation5 + $0x28] sm:$0xff]  ;;  %v506_v42 = vor.u32 %v648_v37, %v503_v38  ;;  %v647_v44 = vld [vmem:[#allocation3 + $0x14] sm:$0xf0]  ;;  %v646_v45 = vld [vmem:[#allocation3 + $0x14] sm:$0xf] }
  0x19   :  { %172 = vmatpush.bf16.msra.mxu0 %v526_v17  ;;  %346 = vmatpush.bf16.msra.mxu3 %v674_v32  ;;  %v673_v40 = vld [vmem:[#allocation5 + $0x68] sm:$0xff]  ;;  %v495_v46 = vld [vmem:[#allocation3 + $0x18] sm:$0xf0]  ;;  %v664_v47 = vld [vmem:[#allocation5 + $0x20] sm:$0xff]  ;;  %v494_v49 = vor.u32 %v647_v44, %v493_v43 }
  0x1a   :  { %185 = vmatpush.bf16.msra.mxu1 %v530_v18  ;;  %v672_v48 = vld [vmem:[#allocation5 + $0x60] sm:$0xff]  ;;  %v498_v50 = vor.u32 %v646_v45, %v495_v46  ;;  %v645_v52 = vld [vmem:[#allocation3 + $0x4] sm:$0xf0]  ;;  %v487_v54 = vld [vmem:[#allocation3 + $0x8] sm:$0xf0] }
  0x1b   :  { %v485_v51 = vld [vmem:[#allocation3] sm:$0xf]  ;;  %v644_v53 = vld [vmem:[#allocation3 + $0x4] sm:$0xf]  ;;  %v663_v55 = vld [vmem:[#allocation5 + $0x18] sm:$0xff] }
  0x1c   :  { %334 = vmatpush.bf16.msra.mxu2 %v665_v39  ;;  %v671_v56 = vld [vmem:[#allocation5 + $0x58] sm:$0xff]  ;;  %v486_v57 = vor.u32 %v645_v52, %v485_v51  ;;  %v490_v59 = vor.u32 %v644_v53, %v487_v54  ;;  %v662_v60 = vld [vmem:[#allocation5 + $0x10] sm:$0xff]  ;;  %v661_v63 = vld [vmem:[#allocation5 + $0x8] sm:$0xff] }
  0x1d   :  { %173 = vmatpush.bf16.msra.mxu0 %v518_v23  ;;  %347 = vmatpush.bf16.msra.mxu3 %v673_v40  ;;  %v66_v58 = vld [vmem:[%s857_s0] sm:$0xff]  ;;  %v670_v61 = vld [vmem:[#allocation5 + $0x50] sm:$0xff]  ;;  %v669_v0 = vld [vmem:[#allocation5 + $0x48] sm:$0xff] }
  0x1e   :  { %186 = vmatpush.bf16.msra.mxu1 %v522_v26  ;;  %v67_v62 = vpack.c.bf16 %v66_v58, %v66_v58  ;;  %v660_v1 = vld [vmem:[#allocation5] sm:$0xff]  ;;  %v683_v3 = vld [vmem:[%s862_s5 + $0x38] sm:$0xff]  ;;  %v682_v4 = vld [vmem:[%s862_s5 + $0x30] sm:$0xff] }
  0x1f   :  { %v668_v2 = vld [vmem:[#allocation5 + $0x40] sm:$0xff]  ;;  %v679_v7 = vld [vmem:[%s862_s5 + $0x18] sm:$0xff]  ;;  %v678_v9 = vld [vmem:[%s862_s5 + $0x10] sm:$0xff] }
  0x20   :  { %335 = vmatpush.bf16.msra.mxu2 %v664_v47  ;;  %v681_v5 = vld [vmem:[%s862_s5 + $0x28] sm:$0xff]  ;;  %v680_v6 = vld [vmem:[%s862_s5 + $0x20] sm:$0xff] }
  0x21   :  { %174 = vmatpush.bf16.msra.mxu0 %v510_v34  ;;  %348 = vmatpush.bf16.msra.mxu3 %v672_v48  ;;  %v84_v8 = vld [vmem:[%s859_s2] sm:$0x3]  ;;  %v677_v22 = vld [vmem:[%s862_s5 + $0x8] sm:$0xff] }
  0x22   :  { %187 = vmatpush.bf16.msra.mxu1 %v514_v36  ;;  %v86_v10 = vperm.slane %v84_v8, 0  ;;  %v87_v11 = vperm.slane %v84_v8, 1  ;;  %v676_v23 = vld [vmem:[%s862_s5] sm:$0xff] }
  0x23   :  { %v690_v24 = vld [vmem:[%s861_s4] ss:$0 sm:$0xff] }
  0x24   :  { %336 = vmatpush.bf16.msra.mxu2 %v663_v55  ;;  %v691_v33 = vld [vmem:[%s863_s6] ss:$0 sm:$0xff] }
  0x25   :  { %175 = vmatpush.bf16.msra.mxu0 %v502_v41  ;;  %349 = vmatpush.bf16.msra.mxu3 %v671_v56  ;;  %v692_v36 = vld [vmem:[%s864_s7] ss:$0 sm:$0xff] }
  0x26   :  { %188 = vmatpush.bf16.msra.mxu1 %v506_v42  ;;  %v693_v41 = vld [vmem:[#allocation2] ss:$0 sm:$0xff] }
  0x28   :  { %337 = vmatpush.bf16.msra.mxu2 %v662_v60 }
  0x29   :  { %176 = vmatpush.bf16.msra.mxu0 %v494_v49  ;;  %350 = vmatpush.bf16.msra.mxu3 %v670_v61 }
  0x2a   :  { %189 = vmatpush.bf16.msra.mxu1 %v498_v50 }
  0x2c   :  { %338 = vmatpush.bf16.msra.mxu2 %v661_v63 }
  0x2d   :  { %177 = vmatpush.bf16.msra.mxu0 %v486_v57  ;;  %351 = vmatpush.bf16.msra.mxu3 %v669_v0 }
  0x2e   :  { %190 = vmatpush.bf16.msra.mxu1 %v490_v59 }
  0x30   :  { %178 = vmatmul.bf16.vlgmr.msra.gmra.mxu0 %v67_v62  ;;  %339 = vmatpush.bf16.msra.mxu2 %v660_v1 }
  0x31   :  { %191 = vmatmul.bf16.vlgmr.msra.gmra.mxu1 %v67_v62  ;;  %352 = vmatpush.bf16.msra.mxu3 %v668_v2 }
  0x32   :  { %428 = vmatpush.bf16.msrb.mxu0 %v683_v3 }
  0x36   :  { %429 = vmatpush.bf16.msrb.mxu0 %v682_v4 }
  0x3a   :  { %430 = vmatpush.bf16.msrb.mxu0 %v681_v5 }
  0x3e   :  { %431 = vmatpush.bf16.msrb.mxu0 %v680_v6 }
  0x42   :  { %432 = vmatpush.bf16.msrb.mxu0 %v679_v7 }
  0x46   :  { %433 = vmatpush.bf16.msrb.mxu0 %v678_v9 }
  0x4a   :  { %434 = vmatpush.bf16.msrb.mxu0 %v677_v22 }
  0x4e   :  { %435 = vmatpush.bf16.msrb.mxu0 %v676_v23 }
  0xad   :  { %v179_v12 = vpop.f32.mrf.mxu0 }
  0xae   :  { %v180_v13 = vadd.f32 %v179_v12, %v86_v10  ;;  %v192_v14 = vpop.f32.mrf.mxu1 }
  0xaf   :  { %v193_v15 = vadd.f32 %v192_v14, %v87_v11 }
  0xb0   :  { %v196_v16 = vmax.f32 %v180_v13, 0.0 }
  0xb1   :  { %v197_v17 = vmax.f32 %v193_v15, 0.0 }
  0xb2   :  { %v198_v18 = vpack.c.bf16 %v196_v16, %v196_v16 }
  0xb3   :  { %v199_v19 = vpack.c.bf16 %v197_v17, %v197_v17 }
  0xb4   :  { %340 = vmatmul.bf16.vlgmr.msra.gmra.mxu2 %v198_v18 }
  0xb5   :  { %353 = vmatmul.bf16.vlgmr.msra.gmra.mxu3 %v199_v19  ;;  %v181_v20 = vpop.f32.mrf.mxu0 }
  0xb6   :  { %v194_v21 = vpop.f32.mrf.mxu1 }
 0x137   :  { %v341_v25 = vpop.f32.mrf.mxu2 }
 0x138   :  { %v342_v26 = vadd.f32 %v690_v24, %v341_v25  ;;  %v354_v27 = vpop.f32.mrf.mxu3 }
 0x13a   :  { %v355_v28 = vadd.f32 %v354_v27, %v342_v26 }
 0x13c   :  { %v358_v29 = vmax.f32 %v355_v28, 0.0 }
 0x13e   :  { %v359_v30 = vpack.c.bf16 %v358_v29, %v358_v29 }
 0x13f   :  { %v343_v31 = vpop.f32.mrf.mxu2 }
 0x140   :  { %v356_v32 = vpop.f32.mrf.mxu3  ;;  %436 = vmatmul.bf16.vlgmr.msrb.gmra.mxu0 %v359_v30 }
 0x1bd   :  { %v437_v34 = vpop.f32.mrf.mxu0 }
 0x1be   :  { %v438_v35 = vadd.f32 %v691_v33, %v437_v34 }
 0x1c0   :  { %v441_v37 = vmax.f32 %v438_v35, 0.0 }
 0x1c2   :  { %v446_v38 = vmul.f32 %v692_v36, %v441_v37 }
 0x1c4   :  { %v448_v39 = vsel %vm447_vm0, %v446_v38, 0.0 }
 0x1c5   :  { %v439_v40 = vpop.f32.mrf.mxu0  ;;  %449 = vadd.xlane.f32.xlu0 %v448_v39 }
 0x238   :  { %v450_v42 = vpop.xlane.xlu0 %449 }
 0x239   :  { %v455_v43 = vadd.f32 %v693_v41, %v450_v42 }
 0x23b   :  { %v643_v44 = vmul.f32 -1.442695, %v455_v43 }
 0x23d   :  { %694 = vpow2.f32 %v643_v44 }
 0x243   :  { %v695_v45 = vpop.eup %694 }
 0x244   :  { %v459_v46 = vadd.f32 1.0, %v695_v45 }
 0x246   :  { %696 = vrcp.f32 %v459_v46  ;;  %v471_v50 = vand.u32 2147483648, %v459_v46  ;;  %v469_v52 = vand.u32 2147483647, %v459_v46  ;;  %vm465_vm2 = vweird.f32 %v459_v46 }
 0x248   :  { %v472_v54 = vor.u32 1.1754944e-38, %v471_v50  ;;  %vm470_vm5 = vcmp.eq.f32.partialorder %v469_v52, 8.507059e+37 }
 0x24c   :  { %v697_v47 = vpop.eup %696 }
 0x24d   :  { %v461_v48 = vmul.f32 %v697_v47, %v459_v46  ;;  %vm466_vm1 = vweird.f32 %v697_v47 }
 0x24e   :  { %vm467_vm3 = vmor %vm465_vm2, %vm466_vm1 }
 0x24f   :  { %v462_v49 = vsub.f32 1.0, %v461_v48 }
 0x251   :  { %v463_v51 = vmul.f32 %v697_v47, %v462_v49 }
 0x253   :  { %v464_v53 = vadd.f32 %v697_v47, %v463_v51 }
 0x255   :  { %v468_v55 = vsel %vm467_vm3, %v697_v47, %v464_v53 }
 0x256   :  { %v473_v56 = vsel %vm470_vm5, %v472_v54, %v468_v55 }
 0x257   :  { %476 = vst.msk [vmem:[%s866_s9] sm:$0xff] %vm475_vm4, %v473_v56 }
 0x258   :  { %481 = vsyncpa [#allocation4], 1 }
 0x259   :  { %482 = vsyncpa [#allocation6], 1 }

</bundles_post_ra>
